<compile_context>
chip_gen: v5e
topology: v5e:2x2
jax: 0.10.0
libtpu: 0.0.40
codegen_flags: <defaults>
</compile_context>

<pallas_src>
import functools

import jax
import jax.numpy as jnp
import numpy as np
from jax.experimental import pallas as pl
from jax.experimental.pallas import tpu as pltpu

KH = KW = 5
C_IN = 6
N_OUT = 16

CH_IN_3 = [[0, 1, 2], [1, 2, 3], [2, 3, 4], [3, 4, 5], [0, 4, 5], [0, 1, 5]]
CH_IN_4 = [[0, 1, 2, 3], [1, 2, 3, 4], [2, 3, 4, 5], [0, 3, 4, 5], [0, 1, 4, 5],
           [0, 1, 2, 5], [0, 1, 3, 4], [1, 2, 4, 5], [0, 2, 3, 5]]
GROUPS = CH_IN_3 + CH_IN_4 + [list(range(C_IN))]

MAX_MT = 2048  # M rows per grid step (== ~205 images); ~4.9 MiB double-buffered VMEM.


def _round_up(x, m):
    return (x + m - 1) // m * m


# ----------------------------------------------------------------------------
# Pallas kernel: one M-row tile per grid step.
#   lhs_ref : (MT, K)    bf16   K-folded image rows, K = KH * W * C = 420
#   w_ref   : (K, WON)   bf16   Toeplitz + K-folded weights, WON = WO*16 = 160
#   b_ref   : (1, WON)   f32    bias replicated across the WO output columns
#   o_ref   : (MT, WON)  bf16/f32
# Single MXU dot with f32 accumulation, bias added once, cast at the store.
# ----------------------------------------------------------------------------
def _c3_kernel(lhs_ref, w_ref, b_ref, o_ref):
    acc = jnp.dot(lhs_ref[...], w_ref[...], preferred_element_type=jnp.float32)
    o_ref[...] = (acc + b_ref[...]).astype(o_ref.dtype)


# ----------------------------------------------------------------------------
# Parameter construction / packing (done once at init, never per forward)
# ----------------------------------------------------------------------------
def init_params(key):
    """Per-subset Conv2d params (PyTorch default U(+-1/sqrt(fan_in))) densified
    into a single (16, 6, 5, 5) weight with zeros on disconnected channels."""
    w_dense = np.zeros((N_OUT, C_IN, KH, KW), np.float32)
    b_dense = np.zeros((N_OUT,), np.float32)
    for n, idxs in enumerate(GROUPS):
        key, kw_key, kb_key = jax.random.split(key, 3)
        bound = 1.0 / float(np.sqrt(len(idxs) * KH * KW))
        w = jax.random.uniform(kw_key, (len(idxs), KH, KW), jnp.float32, -bound, bound)
        b = jax.random.uniform(kb_key, (), jnp.float32, -bound, bound)
        w_dense[n, np.asarray(idxs)] = np.asarray(w)
        b_dense[n] = float(b)
    return w_dense, b_dense


def pack_params(w_dense, b_dense, W):
    """Toeplitz-pack + K-fold for a fixed input width W:
        w_big[di*W*C + w*C + c, j*N + n] = w_dense[n, c, di, w - j]  if 0<=w-j<KW
    so the whole conv becomes one (B*HO, KH*W*C) @ (KH*W*C, WO*N) matmul that
    contracts kernel-height, kernel-width and input-channel simultaneously."""
    WO = W - KW + 1
    WC, WON = W * C_IN, WO * N_OUT
    wp = w_dense.transpose(2, 3, 1, 0)                  # (KH, KW, C, N)
    w_big = np.zeros((KH, WC, WON), np.float32)
    for dj in range(KW):
        for j in range(WO):
            w_big[:, (j + dj) * C_IN:(j + dj + 1) * C_IN,
                  j * N_OUT:(j + 1) * N_OUT] = wp[:, dj]
    w_big = w_big.reshape(KH * WC, WON)                 # K-fold: (420, 160)
    b_big = np.tile(b_dense, WO).reshape(1, WON)
    # bf16 weights feed the MXU (f32 accumulation in-kernel); bias stays f32.
    return jnp.asarray(w_big, jnp.bfloat16), jnp.asarray(b_big, jnp.float32)


# ----------------------------------------------------------------------------
# Forward: NCHW in, NHWC (B, HO, WO, 16) out (kernel-native, no data movement)
# ----------------------------------------------------------------------------
def c3_forward(w_big, b_big, x_nchw, *, out_dtype=jnp.bfloat16, max_mt=MAX_MT):
    B, C, H, W = x_nchw.shape
    assert C == C_IN
    HO, WO = H - KH + 1, W - KW + 1
    WC = W * C_IN
    K = KH * WC
    WON = WO * N_OUT
    assert w_big.shape == (K, WON) and b_big.shape == (1, WON)

    # NCHW -> NHWC -> (B, H, W*C); bf16 halves DMA bytes into the kernel.
    x2d = jnp.transpose(x_nchw, (0, 2, 3, 1)).astype(jnp.bfloat16).reshape(B, H, WC)
    # K-fold the KH row shifts into the contraction axis:
    #   lhs[b*HO + i, di*WC + col] = x2d[b, i + di, col]
    lhs = jnp.concatenate([x2d[:, di:di + HO, :] for di in range(KH)], axis=-1)
    lhs = lhs.reshape(B * HO, K)

    # Batch folded into the matmul M dimension; pad M to a grid-tile multiple.
    M = B * HO
    mt = min(max_mt, _round_up(M, 16))
    m_pad = _round_up(M, mt)
    if m_pad != M:
        lhs = jnp.pad(lhs, ((0, m_pad - M), (0, 0)))

    flops = 2 * m_pad * K * WON
    bytes_accessed = (m_pad * K * 2 + K * WON * 2 + WON * 4
                      + m_pad * WON * jnp.dtype(out_dtype).itemsize)

    out = pl.pallas_call(
        _c3_kernel,
        out_shape=jax.ShapeDtypeStruct((m_pad, WON), out_dtype),
        grid=(m_pad // mt,),
        in_specs=[
            pl.BlockSpec((mt, K), lambda m: (m, 0)),      # LHS row tile
            pl.BlockSpec((K, WON), lambda m: (0, 0)),     # weights: VMEM-resident
            pl.BlockSpec((1, WON), lambda m: (0, 0)),     # bias row: VMEM-resident
        ],
        out_specs=pl.BlockSpec((mt, WON), lambda m: (m, 0)),
        compiler_params=pltpu.CompilerParams(
            dimension_semantics=("parallel",)),
        cost_estimate=pl.CostEstimate(
            flops=flops, transcendentals=0, bytes_accessed=bytes_accessed),
    )(lhs, w_big, b_big)

    # Drop padded rows; row-major (B*HO, WO*N) == (B, HO, WO, N): free reshape.
    return out[:M].reshape(B, HO, WO, N_OUT)


def c3_reference(w_dense, b_dense, x_nchw):
    """Pure-XLA dense-conv reference (the densified weights are exactly the
    PyTorch per-subset convs)."""
    out = jax.lax.conv_general_dilated(
        x_nchw, jnp.asarray(w_dense), window_strides=(1, 1), padding="VALID",
        dimension_numbers=("NCHW", "OIHW", "NCHW"))
    return out + jnp.asarray(b_dense)[None, :, None, None]


if __name__ == "__main__":
    key = jax.random.PRNGKey(0)
    pkey, xkey = jax.random.split(key)
    w_dense, b_dense = init_params(pkey)

    B, H, W = 2, 14, 14                       # C3's LeNet input: 6 x 14 x 14
    HO, WO = H - KH + 1, W - KW + 1
    w_big, b_big = pack_params(w_dense, b_dense, W)
    x = jax.random.normal(xkey, (B, C_IN, H, W), jnp.float32)

    fwd = jax.jit(functools.partial(c3_forward, out_dtype=jnp.bfloat16))
    out_nhwc = fwd(w_big, b_big, x)
    jax.block_until_ready(out_nhwc)
    assert out_nhwc.shape == (B, HO, WO, N_OUT), out_nhwc.shape

    # Numerical check vs XLA conv (bf16 matmul inputs + bf16 store -> loose tol).
    ref_nhwc = jnp.transpose(c3_reference(w_dense, b_dense, x), (0, 2, 3, 1))
    max_err = float(jnp.max(jnp.abs(out_nhwc.astype(jnp.float32) - ref_nhwc)))
    assert max_err < 5e-2, max_err
    print("KERNEL_OK")
</pallas_src>

<mosaic_0001>
module attributes {stable_mosaic.version = 11 : i64} {
  func.func @_c3_kernel(%arg0: i32, %arg1: memref<32x420xbf16, #tpu.memory_space<vmem>>, %arg2: memref<420x160xbf16, #tpu.memory_space<vmem>>, %arg3: memref<1x160xf32, #tpu.memory_space<vmem>>, %arg4: memref<32x160xbf16, #tpu.memory_space<vmem>>) attributes {dimension_semantics = [#tpu.dimension_semantics<parallel>], iteration_bounds = array<i64: 1>, scalar_prefetch = 0 : i64, scratch_operands = 0 : i64, tpu.core_type = #tpu.core_type<tc>, window_params = [{transform_indices = @transform_0, window_bounds = array<i64: 32, 420>}, {pipeline_mode = #tpu.pipeline_mode<synchronous>, transform_indices = @transform_1, window_bounds = array<i64: 420, 160>}, {pipeline_mode = #tpu.pipeline_mode<synchronous>, transform_indices = @transform_2, window_bounds = array<i64: 1, 160>}, {transform_indices = @transform_3, window_bounds = array<i64: 32, 160>}]} {
    %c0 = arith.constant 0 : index
    %c0_0 = arith.constant 0 : index
    %0 = vector.load %arg1[%c0, %c0_0] : memref<32x420xbf16, #tpu.memory_space<vmem>>, vector<32x420xbf16>
    %c0_1 = arith.constant 0 : index
    %c0_2 = arith.constant 0 : index
    %1 = vector.load %arg2[%c0_1, %c0_2] : memref<420x160xbf16, #tpu.memory_space<vmem>>, vector<420x160xbf16>
    %cst = arith.constant dense<0.000000e+00> : vector<32x160xf32>
    %2 = tpu.matmul %0, %1, %cst {dimension_numbers = #tpu.dot_dimension_numbers<[1], [0], [0], [1], [0, 0, 1, 1], [], []>} : vector<32x420xbf16>, vector<420x160xbf16>, vector<32x160xf32> -> vector<32x160xf32>
    %c0_3 = arith.constant 0 : index
    %c0_4 = arith.constant 0 : index
    %3 = vector.load %arg3[%c0_3, %c0_4] : memref<1x160xf32, #tpu.memory_space<vmem>>, vector<1x160xf32>
    %4 = vector.broadcast %3 : vector<1x160xf32> to vector<32x160xf32>
    %5 = arith.addf %2, %4 : vector<32x160xf32>
    %6 = arith.truncf %5 : vector<32x160xf32> to vector<32x160xbf16>
    %c0_5 = arith.constant 0 : index
    %c0_6 = arith.constant 0 : index
    %7 = vector.load %arg4[%c0_5, %c0_6] : memref<32x160xbf16, #tpu.memory_space<vmem>>, vector<32x160xbf16>
    tpu.vector_store %arg4[%c0_5, %c0_6], %6 {strides = array<i32>} : memref<32x160xbf16, #tpu.memory_space<vmem>>, vector<32x160xbf16>,
    return
  }
  func.func @transform_0(%arg0: i32) -> (i32, i32) {
    %c0_i32 = arith.constant 0 : i32
    %c0_i32_0 = arith.constant 0 : i32
    return %arg0, %c0_i32 : i32, i32
  }
  func.func @transform_1(%arg0: i32) -> (i32, i32) {
    %c0_i32 = arith.constant 0 : i32
    %c0_i32_0 = arith.constant 0 : i32
    %c0_i32_1 = arith.constant 0 : i32
    return %c0_i32, %c0_i32_0 : i32, i32
  }
  func.func @transform_2(%arg0: i32) -> (i32, i32) {
    %c0_i32 = arith.constant 0 : i32
    %c0_i32_0 = arith.constant 0 : i32
    %c0_i32_1 = arith.constant 0 : i32
    return %c0_i32, %c0_i32_0 : i32, i32
  }
  func.func @transform_3(%arg0: i32) -> (i32, i32) {
    %c0_i32 = arith.constant 0 : i32
    %c0_i32_0 = arith.constant 0 : i32
    return %arg0, %c0_i32 : i32, i32
  }
}

</mosaic_0001>

<bundles_post_ra>
// kernel: c3_forward.1
= control target key start
LH: loop header
LB: loop body
LE: loop exit
PB: predicated region body
PF: predicated region fallthrough
CT: control target
= control target key end

     0   :  { %vm392_vm0 = vcmask 1041408   ;;  %vm385_vm1 = vcmask 293888   ;;  %vm555_vm2 = vcmask 1043456   ;;  %vm556_vm3 = vcmask 261124   ;;  %s1333_s1 = inlined_call_operand.vmem [shape: bf16[420,160], index: 1, kind: input, shape index: {}]   ;;  %s1334_s0 = inlined_call_operand.vmem [shape: bf16[32,420], index: 0, kind: input, shape index: {}]   ;;  %s1335_s2 = inlined_call_operand.vmem [shape: f32[1,160], index: 2, kind: input, shape index: {}]   ;;  %s1336_s3 = inlined_call_operand.vmem [shape: bf16[32,160], index: 3, kind: output, shape index: {}]  }
   0x1   :  { %v656_v0 = vld [vmem:[%s1333_s1 + $0x70] sm:$0xf]  ;;  %v833_v1 = vld [vmem:[%s1333_s1 + $0x74] sm:$0xf0]  ;;  %v919_v9 = vld [vmem:[%s1333_s1 + $0x1a0] sm:$0x33] }
   0x2   :  { %v720_v2 = vld [vmem:[%s1333_s1 + $0xf0] sm:$0xf]  ;;  %v657_v3 = vor.u32 %v833_v1, %v656_v0  ;;  %v849_v4 = vld [vmem:[%s1333_s1 + $0xf4] sm:$0xf0]  ;;  %v648_v10 = vld [vmem:[%s1333_s1 + $0x60] sm:$0xf]  ;;  %v277_v12 = vunpack.c.l.b16 %v919_v9 }
   0x3   :  { %v784_v5 = vld [vmem:[%s1333_s1 + $0x170] sm:$0xf]  ;;  %v865_v6 = vld [vmem:[%s1333_s1 + $0x174] sm:$0xf0]  ;;  %v721_v7 = vor.u32 %v849_v4, %v720_v2  ;;  %v831_v11 = vld [vmem:[%s1333_s1 + $0x64] sm:$0xf0] }
   0x4   :  { %v785_v8 = vor.u32 %v865_v6, %v784_v5  ;;  %399 = vmatpush.bf16.msra.mxu0 %v657_v3  ;;  %v649_v13 = vor.u32 %v831_v11, %v648_v10  ;;  %v712_v14 = vld [vmem:[%s1333_s1 + $0xe0] sm:$0xf]  ;;  %v847_v15 = vld [vmem:[%s1333_s1 + $0xe4] sm:$0xf0]  ;;  %v800_v19 = vld [vmem:[%s1333_s1 + $0x190] sm:$0xf]  ;;  %v331_v21 = vpack.c.b16 %v277_v12, %v277_v12 }
   0x5   :  { %v776_v16 = vld [vmem:[%s1333_s1 + $0x160] sm:$0xf]  ;;  %418 = vmatpush.bf16.msra.mxu1 %v721_v7  ;;  %v713_v17 = vor.u32 %v847_v15, %v712_v14  ;;  %v863_v18 = vld [vmem:[%s1333_s1 + $0x164] sm:$0xf0]  ;;  %v869_v20 = vld [vmem:[%s1333_s1 + $0x194] sm:$0xf0] }
   0x6   :  { %437 = vmatpush.bf16.msra.mxu2 %v785_v8  ;;  %v777_v22 = vor.u32 %v863_v18, %v776_v16  ;;  %v640_v23 = vld [vmem:[%s1333_s1 + $0x50] sm:$0xf]  ;;  %v829_v24 = vld [vmem:[%s1333_s1 + $0x54] sm:$0xf0]  ;;  %v394_v29 = vsel %vm392_vm0, %v331_v21, 0  ;;  %v801_v31 = vor.u32 %v869_v20, %v800_v19  ;;  %vm1308_vm4 = vmor %vm556_vm3, %vm555_vm2 }
   0x7   :  { %v704_v25 = vld [vmem:[%s1333_s1 + $0xd0] sm:$0xf]  ;;  %v845_v26 = vld [vmem:[%s1333_s1 + $0xd4] sm:$0xf0]  ;;  %v641_v30 = vor.u32 %v829_v24, %v640_v23  ;;  %461 = vmatpush.bf16.msra.mxu3 %v394_v29  ;;  %v792_v33 = vld [vmem:[%s1333_s1 + $0x180] sm:$0xf] }
   0x8   :  { %v768_v27 = vld [vmem:[%s1333_s1 + $0x150] sm:$0xf]  ;;  %v861_v28 = vld [vmem:[%s1333_s1 + $0x154] sm:$0xf0]  ;;  %400 = vmatpush.bf16.msra.mxu0 %v649_v13  ;;  %v705_v32 = vor.u32 %v845_v26, %v704_v25  ;;  %v632_v34 = vld [vmem:[%s1333_s1 + $0x40] sm:$0xf] }
   0x9   :  { %419 = vmatpush.bf16.msra.mxu1 %v713_v17  ;;  %v827_v35 = vld [vmem:[%s1333_s1 + $0x44] sm:$0xf0]  ;;  %v769_v36 = vor.u32 %v861_v28, %v768_v27  ;;  %v696_v38 = vld [vmem:[%s1333_s1 + $0xc0] sm:$0xf]  ;;  %v832_v42 = vld [vmem:[%s1333_s1 + $0x74] sm:$0xf]  ;;  %v278_v28 = vunpack.c.h.b16 %v919_v9 }
   0xa   :  { %438 = vmatpush.bf16.msra.mxu2 %v777_v22  ;;  %v867_v37 = vld [vmem:[%s1333_s1 + $0x184] sm:$0xf0]  ;;  %v760_v40 = vld [vmem:[%s1333_s1 + $0x140] sm:$0xf]  ;;  %v633_v43 = vor.u32 %v827_v35, %v632_v34  ;;  %v811_v44 = vld [vmem:[%s1334_s0 + $0xc] sm:$0xf] }
   0xb   :  { %v843_v39 = vld [vmem:[%s1333_s1 + $0xc4] sm:$0xf0]  ;;  %v658_v45 = vld [vmem:[%s1333_s1 + $0x78] sm:$0xf0]  ;;  %462 = vmatpush.bf16.msra.mxu3 %v801_v31  ;;  %v793_v46 = vor.u32 %v867_v37, %v792_v33  ;;  %v624_v49 = vld [vmem:[%s1333_s1 + $0x30] sm:$0xf] }
   0xc   :  { %v859_v41 = vld [vmem:[%s1333_s1 + $0x144] sm:$0xf0]  ;;  %401 = vmatpush.bf16.msra.mxu0 %v641_v30  ;;  %v697_v47 = vor.u32 %v843_v39, %v696_v38  ;;  %v578_v48 = vld [vmem:[%s1334_s0 + $0x18] sm:$0xf0]  ;;  %v825_v50 = vld [vmem:[%s1333_s1 + $0x34] sm:$0xf0]  ;;  %v661_v52 = vor.u32 %v832_v42, %v658_v45 }
   0xd   :  { %420 = vmatpush.bf16.msra.mxu1 %v705_v32  ;;  %v761_v51 = vor.u32 %v859_v41, %v760_v40  ;;  %v688_v53 = vld [vmem:[%s1333_s1 + $0xb0] sm:$0xf]  ;;  %v841_v54 = vld [vmem:[%s1333_s1 + $0xb4] sm:$0xf0]  ;;  %v830_v57 = vld [vmem:[%s1333_s1 + $0x64] sm:$0xf]  ;;  %v1025_v59 = vor.u32 %v811_v44, %v578_v48  ;;  %v625_v60 = vor.u32 %v825_v50, %v624_v49 }
   0xe   :  { %439 = vmatpush.bf16.msra.mxu2 %v769_v36  ;;  %v752_v55 = vld [vmem:[%s1333_s1 + $0x130] sm:$0xf]  ;;  %v857_v56 = vld [vmem:[%s1333_s1 + $0x134] sm:$0xf0]  ;;  %v650_v58 = vld [vmem:[%s1333_s1 + $0x68] sm:$0xf0]  ;;  %v689_v61 = vor.u32 %v841_v54, %v688_v53 }
   0xf   :  { %463 = vmatpush.bf16.msra.mxu3 %v793_v46  ;;  %v616_v62 = vld [vmem:[%s1333_s1 + $0x20] sm:$0xf]  ;;  %v823_v63 = vld [vmem:[%s1333_s1 + $0x24] sm:$0xf0]  ;;  %v753_v0 = vor.u32 %v857_v56, %v752_v55  ;;  %v653_v1 = vor.u32 %v830_v57, %v650_v58  ;;  %v828_v6 = vld [vmem:[%s1333_s1 + $0x54] sm:$0xf] }
  0x10   :  { %402 = vmatpush.bf16.msra.mxu0 %v633_v43  ;;  %v680_v2 = vld [vmem:[%s1333_s1 + $0xa0] sm:$0xf]  ;;  %v839_v3 = vld [vmem:[%s1333_s1 + $0xa4] sm:$0xf0]  ;;  %v642_v7 = vld [vmem:[%s1333_s1 + $0x58] sm:$0xf0]  ;;  %v617_v8 = vor.u32 %v823_v63, %v616_v62 }
  0x11   :  { %421 = vmatpush.bf16.msra.mxu1 %v697_v47  ;;  %v744_v4 = vld [vmem:[%s1333_s1 + $0x120] sm:$0xf]  ;;  %v855_v5 = vld [vmem:[%s1333_s1 + $0x124] sm:$0xf0]  ;;  %v681_v10 = vor.u32 %v839_v3, %v680_v2  ;;  %v608_v11 = vld [vmem:[%s1333_s1 + $0x10] sm:$0xf]  ;;  %v645_v14 = vor.u32 %v828_v6, %v642_v7  ;;  %v332_v47 = vpack.c.b16 %v278_v28, %v278_v28 }
  0x12   :  { %440 = vmatpush.bf16.msra.mxu2 %v761_v51  ;;  %806 = vmatmul.msk.bf16.vlgmr.msra.gmra.mxu3 %vm385_vm1, %v1025_v59  ;;  %v821_v12 = vld [vmem:[%s1333_s1 + $0x14] sm:$0xf0]  ;;  %v745_v13 = vor.u32 %v855_v5, %v744_v4  ;;  %v672_v15 = vld [vmem:[%s1333_s1 + $0x90] sm:$0xf]  ;;  %v826_v19 = vld [vmem:[%s1333_s1 + $0x44] sm:$0xf] }
  0x13   :  { %475 = vmatpush.bf16.msrb.mxu3 %v661_v52  ;;  %v837_v16 = vld [vmem:[%s1333_s1 + $0x94] sm:$0xf0]  ;;  %v736_v17 = vld [vmem:[%s1333_s1 + $0x110] sm:$0xf]  ;;  %v634_v20 = vld [vmem:[%s1333_s1 + $0x48] sm:$0xf0]  ;;  %v609_v21 = vor.u32 %v821_v12, %v608_v11 }
  0x14   :  { %403 = vmatpush.bf16.msra.mxu0 %v625_v60  ;;  %v853_v18 = vld [vmem:[%s1333_s1 + $0x114] sm:$0xf0]  ;;  %v600_v22 = vld [vmem:[%s1333_s1] sm:$0xf]  ;;  %v819_v23 = vld [vmem:[%s1333_s1 + $0x4] sm:$0xf0]  ;;  %v673_v24 = vor.u32 %v837_v16, %v672_v15  ;;  %v637_v30 = vor.u32 %v826_v19, %v634_v20 }
  0x15   :  { %422 = vmatpush.bf16.msra.mxu1 %v689_v61  ;;  %v664_v25 = vld [vmem:[%s1333_s1 + $0x80] sm:$0xf]  ;;  %v835_v26 = vld [vmem:[%s1333_s1 + $0x84] sm:$0xf0]  ;;  %v737_v29 = vor.u32 %v853_v18, %v736_v17  ;;  %v848_v32 = vld [vmem:[%s1333_s1 + $0xf4] sm:$0xf]  ;;  %v601_v38 = vor.u32 %v819_v23, %v600_v22 }
  0x16   :  { %441 = vmatpush.bf16.msra.mxu2 %v753_v0  ;;  %v728_v27 = vld [vmem:[%s1333_s1 + $0x100] sm:$0xf]  ;;  %v851_v31 = vld [vmem:[%s1333_s1 + $0x104] sm:$0xf0]  ;;  %v722_v33 = vld [vmem:[%s1333_s1 + $0xf8] sm:$0xf0]  ;;  %v665_v42 = vor.u32 %v835_v26, %v664_v25 }
  0x17   :  { %476 = vmatpush.bf16.msrb.mxu3 %v653_v1  ;;  %v815_v9 = vld [vmem:[%s1334_s0 + $0x2c] sm:$0xf]  ;;  %v594_v34 = vld [vmem:[%s1334_s0 + $0x38] sm:$0xf0]  ;;  %v824_v35 = vld [vmem:[%s1333_s1 + $0x34] sm:$0xf]  ;;  %v1135_v46 = vor.u32 %v848_v32, %v722_v33  ;;  %v729_v48 = vor.u32 %v851_v31, %v728_v27 }
  0x18   :  { %404 = vmatpush.bf16.msra.mxu0 %v617_v8  ;;  %v626_v36 = vld [vmem:[%s1333_s1 + $0x38] sm:$0xf0]  ;;  %v568_v37 = vld [vmem:[%s1334_s0] sm:$0xf]  ;;  %v812_v39 = vld [vmem:[%s1334_s0 + $0xc] sm:$0xf0]  ;;  %v1154_v57 = vor.u32 %v815_v9, %v594_v34 }
  0x19   :  { %423 = vmatpush.bf16.msra.mxu1 %v681_v10  ;;  %v864_v40 = vld [vmem:[%s1333_s1 + $0x174] sm:$0xf]  ;;  %v786_v41 = vld [vmem:[%s1333_s1 + $0x178] sm:$0xf0]  ;;  %v810_v43 = vld [vmem:[%s1334_s0 + $0x4] sm:$0xf]  ;;  %v629_v49 = vor.u32 %v824_v35, %v626_v36  ;;  %v1146_v53 = vor.u32 %v812_v39, %v568_v37 }
  0x1a   :  { %442 = vmatpush.bf16.msra.mxu2 %v745_v13  ;;  %v570_v44 = vld [vmem:[%s1334_s0 + $0x10] sm:$0xf0]  ;;  %v576_v45 = vld [vmem:[%s1334_s0 + $0x8] sm:$0xf]  ;;  %v813_v50 = vld [vmem:[%s1334_s0 + $0x14] sm:$0xf0]  ;;  %v789_v54 = vor.u32 %v864_v40, %v786_v41 }
  0x1b   :  { %477 = vmatpush.bf16.msrb.mxu3 %v645_v14  ;;  %v846_v51 = vld [vmem:[%s1333_s1 + $0xe4] sm:$0xf]  ;;  %v714_v52 = vld [vmem:[%s1333_s1 + $0xe8] sm:$0xf0]  ;;  %v1156_v58 = vor.u32 %v810_v43, %v570_v44  ;;  %v1164_v62 = vor.u32 %v813_v50, %v576_v45  ;;  %v397_v63 = vsel %vm392_vm0, %v332_v47, 0 }
  0x1c   :  { %405 = vmatpush.bf16.msra.mxu0 %v609_v21  ;;  %v822_v55 = vld [vmem:[%s1333_s1 + $0x24] sm:$0xf]  ;;  %v618_v56 = vld [vmem:[%s1333_s1 + $0x28] sm:$0xf0]  ;;  %v1168_v0 = vor.u32 %v846_v51, %v714_v52  ;;  %v820_v2 = vld [vmem:[%s1333_s1 + $0x14] sm:$0xf] }
  0x1d   :  { %424 = vmatpush.bf16.msra.mxu1 %v673_v24  ;;  %v862_v60 = vld [vmem:[%s1333_s1 + $0x164] sm:$0xf]  ;;  %v778_v61 = vld [vmem:[%s1333_s1 + $0x168] sm:$0xf0]  ;;  %v621_v1 = vor.u32 %v822_v55, %v618_v56  ;;  %v844_v3 = vld [vmem:[%s1333_s1 + $0xd4] sm:$0xf] }
  0x1e   :  { %443 = vmatpush.bf16.msra.mxu2 %v737_v29  ;;  %v706_v4 = vld [vmem:[%s1333_s1 + $0xd8] sm:$0xf0]  ;;  %v781_v5 = vor.u32 %v862_v60, %v778_v61  ;;  %v868_v7 = vld [vmem:[%s1333_s1 + $0x194] sm:$0xf]  ;;  %v842_v14 = vld [vmem:[%s1333_s1 + $0xc4] sm:$0xf] }
  0x1f   :  { %478 = vmatpush.bf16.msrb.mxu3 %v637_v30  ;;  %v610_v6 = vld [vmem:[%s1333_s1 + $0x18] sm:$0xf0]  ;;  %v860_v10 = vld [vmem:[%s1333_s1 + $0x154] sm:$0xf]  ;;  %v1200_v12 = vor.u32 %v844_v3, %v706_v4  ;;  %v698_v15 = vld [vmem:[%s1333_s1 + $0xc8] sm:$0xf0] }
  0x20   :  { %406 = vmatpush.bf16.msra.mxu0 %v601_v38  ;;  %v802_v8 = vld [vmem:[%s1333_s1 + $0x198] sm:$0xf0]  ;;  %v613_v13 = vor.u32 %v820_v2, %v610_v6  ;;  %v818_v18 = vld [vmem:[%s1333_s1 + $0x4] sm:$0xf]  ;;  %v602_v19 = vld [vmem:[%s1333_s1 + $0x8] sm:$0xf0]  ;;  %v701_v24 = vor.u32 %v842_v14, %v698_v15 }
  0x21   :  { %425 = vmatpush.bf16.msra.mxu1 %v665_v42  ;;  %v770_v11 = vld [vmem:[%s1333_s1 + $0x158] sm:$0xf0]  ;;  %v805_v16 = vor.u32 %v868_v7, %v802_v8  ;;  %v858_v20 = vld [vmem:[%s1333_s1 + $0x144] sm:$0xf]  ;;  %v762_v21 = vld [vmem:[%s1333_s1 + $0x148] sm:$0xf0]  ;;  %v605_v25 = vor.u32 %v818_v18, %v602_v19 }
  0x22   :  { %444 = vmatpush.bf16.msra.mxu2 %v729_v48  ;;  %807 = vmatmul.msk.bf16.gmra.mxu3 %vm385_vm1, %v1154_v57  ;;  %v773_v17 = vor.u32 %v860_v10, %v770_v11  ;;  %v866_v22 = vld [vmem:[%s1333_s1 + $0x184] sm:$0xf]  ;;  %v794_v23 = vld [vmem:[%s1333_s1 + $0x188] sm:$0xf0]  ;;  %v840_v26 = vld [vmem:[%s1333_s1 + $0xb4] sm:$0xf]  ;;  %v765_v29 = vor.u32 %v858_v20, %v762_v21 }
  0x23   :  { %479 = vmatpush.bf16.msrb.mxu3 %v629_v49  ;;  %407 = vmatmul.bf16.vlgmr.msra.gmra.mxu0 %v1146_v53  ;;  %v690_v27 = vld [vmem:[%s1333_s1 + $0xb8] sm:$0xf0]  ;;  %v797_v28 = vor.u32 %v866_v22, %v794_v23  ;;  %v584_v30 = vld [vmem:[%s1334_s0 + $0x20] sm:$0xf]  ;;  %v816_v31 = vld [vmem:[%s1334_s0 + $0x2c] sm:$0xf0] }
  0x24   :  { %494 = vmatpush.bf16.msrb.mxu0 %v1135_v46  ;;  %426 = vmatmul.bf16.vlgmr.msra.gmra.mxu1 %v1156_v58  ;;  %v856_v32 = vld [vmem:[%s1333_s1 + $0x134] sm:$0xf]  ;;  %v754_v33 = vld [vmem:[%s1333_s1 + $0x138] sm:$0xf0]  ;;  %v814_v9 = vld [vmem:[%s1334_s0 + $0x24] sm:$0xf]  ;;  %v693_v35 = vor.u32 %v840_v26, %v690_v27  ;;  %v585_v38 = vor.u32 %v816_v31, %v584_v30 }
  0x25   :  { %513 = vmatpush.bf16.msrb.mxu1 %v789_v54  ;;  %445 = vmatmul.bf16.vlgmr.msra.gmra.mxu2 %v1164_v62  ;;  %v586_v34 = vld [vmem:[%s1334_s0 + $0x30] sm:$0xf0]  ;;  %v592_v36 = vld [vmem:[%s1334_s0 + $0x28] sm:$0xf]  ;;  %v817_v37 = vld [vmem:[%s1334_s0 + $0x34] sm:$0xf0]  ;;  %v757_v39 = vor.u32 %v856_v32, %v754_v33 }
  0x26   :  { %537 = vmatpush.bf16.msrb.mxu2 %v397_v63  ;;  %v838_v40 = vld [vmem:[%s1333_s1 + $0xa4] sm:$0xf]  ;;  %v682_v41 = vld [vmem:[%s1333_s1 + $0xa8] sm:$0xf0]  ;;  %v589_v42 = vor.u32 %v814_v9, %v586_v34  ;;  %v593_v45 = vor.u32 %v817_v37, %v592_v36  ;;  %v836_v48 = vld [vmem:[%s1333_s1 + $0x94] sm:$0xf] }
  0x27   :  { %480 = vmatpush.bf16.msrb.mxu3 %v621_v1  ;;  %v854_v43 = vld [vmem:[%s1333_s1 + $0x124] sm:$0xf]  ;;  %v746_v44 = vld [vmem:[%s1333_s1 + $0x128] sm:$0xf0]  ;;  %v674_v49 = vld [vmem:[%s1333_s1 + $0x98] sm:$0xf0] }
  0x28   :  { %495 = vmatpush.bf16.msrb.mxu0 %v1168_v0  ;;  %v749_v47 = vor.u32 %v854_v43, %v746_v44  ;;  %v852_v50 = vld [vmem:[%s1333_s1 + $0x114] sm:$0xf]  ;;  %v738_v51 = vld [vmem:[%s1333_s1 + $0x118] sm:$0xf0]  ;;  %v677_v52 = vor.u32 %v836_v48, %v674_v49  ;;  %v666_v55 = vld [vmem:[%s1333_s1 + $0x88] sm:$0xf0] }
  0x29   :  { %514 = vmatpush.bf16.msrb.mxu1 %v781_v5  ;;  %v741_v54 = vor.u32 %v852_v50, %v738_v51  ;;  %v850_v56 = vld [vmem:[%s1333_s1 + $0x104] sm:$0xf]  ;;  %v730_v60 = vld [vmem:[%s1333_s1 + $0x108] sm:$0xf0]  ;;  %v76_v10 = vld [vmem:[%s1335_s2] sm:$0x3] }
  0x2a   :  { %538 = vmatpush.bf16.msrb.mxu2 %v805_v16  ;;  %v733_v63 = vor.u32 %v850_v56, %v730_v60  ;;  %v79_v16 = vperm.slane %v76_v10, 1 }
  0x2b   :  { %481 = vmatpush.bf16.msrb.mxu3 %v613_v13  ;;  %v78_v13 = vperm.slane %v76_v10, 0 }
  0x2c   :  { %496 = vmatpush.bf16.msrb.mxu0 %v1200_v12 }
  0x2d   :  { %515 = vmatpush.bf16.msrb.mxu1 %v773_v17 }
  0x2e   :  { %539 = vmatpush.bf16.msrb.mxu2 %v797_v28 }
  0x2f   :  { %482 = vmatpush.bf16.msrb.mxu3 %v605_v25 }
  0x30   :  { %497 = vmatpush.bf16.msrb.mxu0 %v701_v24 }
  0x31   :  { %516 = vmatpush.bf16.msrb.mxu1 %v765_v29 }
  0x32   :  { %483 = vmatmul.bf16.vlgmr.msrb.gmra.mxu3 %v1146_v53  ;;  %v834_v53 = vld [vmem:[%s1333_s1 + $0x84] sm:$0xf] }
  0x33   :  { %870 = vmatpush.bf16.msra.mxu3 %v1135_v46  ;;  %v685_v46 = vor.u32 %v838_v40, %v682_v41  ;;  %412 = vmatmul.bf16.gmra.mxu0 %v585_v38  ;;  %v669_v61 = vor.u32 %v834_v53, %v666_v55 }
  0x34   :  { %498 = vmatpush.bf16.msrb.mxu0 %v693_v35  ;;  %431 = vmatmul.bf16.gmra.mxu1 %v589_v42 }
  0x35   :  { %517 = vmatpush.bf16.msrb.mxu1 %v757_v39  ;;  %450 = vmatmul.bf16.gmra.mxu2 %v593_v45 }
  0x37   :  { %871 = vmatpush.bf16.msra.mxu3 %v1168_v0 }
  0x38   :  { %499 = vmatpush.bf16.msrb.mxu0 %v685_v46 }
  0x39   :  { %518 = vmatpush.bf16.msrb.mxu1 %v749_v47 }
  0x3b   :  { %872 = vmatpush.bf16.msra.mxu3 %v1200_v12 }
  0x3c   :  { %500 = vmatpush.bf16.msrb.mxu0 %v677_v52 }
  0x3d   :  { %519 = vmatpush.bf16.msrb.mxu1 %v741_v54 }
  0x3f   :  { %873 = vmatpush.bf16.msra.mxu3 %v701_v24 }
  0x40   :  { %501 = vmatpush.bf16.msrb.mxu0 %v669_v61 }
  0x41   :  { %520 = vmatpush.bf16.msrb.mxu1 %v733_v63 }
  0x42   :  { %488 = vmatmul.bf16.gmra.mxu3 %v585_v38 }
  0x43   :  { %874 = vmatpush.bf16.msra.mxu3 %v693_v35  ;;  %502 = vmatmul.bf16.vlgmr.msrb.gmra.mxu0 %v1156_v58 }
  0x44   :  { %521 = vmatmul.bf16.vlgmr.msrb.gmra.mxu1 %v1164_v62 }
  0x45   :  { %808 = vmatmul.msk.bf16.vlgmr.msrb.gmra.mxu2 %vm385_vm1, %v1025_v59 }
  0x47   :  { %875 = vmatpush.bf16.msra.mxu3 %v685_v46 }
  0x4b   :  { %876 = vmatpush.bf16.msra.mxu3 %v677_v52 }
  0x4f   :  { %877 = vmatpush.bf16.msra.mxu3 %v669_v61 }
  0x52   :  { %507 = vmatmul.bf16.vlgmr.msra.gmra.mxu3 %v589_v42 }
  0x54   :  { %526 = vmatmul.bf16.gmra.mxu1 %v593_v45 }
  0x55   :  { %809 = vmatmul.msk.bf16.gmra.mxu2 %vm385_vm1, %v1154_v57 }
  0x95   :  { %v465_v0 = vpop.f32.mrf.mxu3 }
  0x9d   :  { %v467_v1 = vpop.f32.mrf.mxu3 }
  0xa0   :  { %v408_v2 = vpop.f32.mrf.mxu0 }
  0xa1   :  { %v427_v3 = vpop.f32.mrf.mxu1  ;;  %v409_v15 = vadd.f32 %v408_v2, %v78_v13 }
  0xa3   :  { %v428_v20 = vadd.f32 %v427_v3, %v409_v15 }
  0xa5   :  { %v470_v4 = vpop.f32.mrf.mxu3 }
  0xa8   :  { %v446_v58 = vpop.f32.mrf.mxu2  ;;  %v410_v5 = vpop.f32.mrf.mxu0 }
  0xa9   :  { %v429_v6 = vpop.f32.mrf.mxu1  ;;  %v447_v24 = vadd.f32 %v446_v58, %v428_v20  ;;  %v411_v25 = vadd.f32 %v410_v5, %v78_v13 }
  0xab   :  { %v466_v30 = vadd.f32 %v465_v0, %v447_v24  ;;  %v430_v9 = vadd.f32 %v429_v6, %v411_v25 }
  0xad   :  { %v1303_v62 = vpop.f32.mrf.mxu3 }
  0xb0   :  { %v448_v7 = vpop.f32.mrf.mxu2  ;;  %v413_v59 = vpop.f32.mrf.mxu0 }
  0xb1   :  { %v432_v8 = vpop.f32.mrf.mxu1  ;;  %v449_v36 = vadd.f32 %v448_v7, %v430_v9  ;;  %v414_v40 = vadd.f32 %v413_v59, %v78_v13 }
  0xb3   :  { %v468_v42 = vadd.f32 %v467_v1, %v449_v36  ;;  %v433_v45 = vadd.f32 %v432_v8, %v414_v40 }
  0xb5   :  { %v484_v11 = vpop.f32.mrf.mxu3 }
  0xb6   :  { %v485_v21 = vadd.f32 %v484_v11, %v79_v16 }
  0xb8   :  { %v451_v12 = vpop.f32.mrf.mxu2  ;;  %v415_v57 = vpop.f32.mrf.mxu0 }
  0xb9   :  { %v434_v14 = vpop.f32.mrf.mxu1  ;;  %v452_v49 = vadd.f32 %v451_v12, %v433_v45  ;;  %v416_v52 = vadd.f32 %v415_v57, %v78_v13 }
  0xbb   :  { %v471_v53 = vadd.f32 %v470_v4, %v452_v49  ;;  %v435_v56 = vadd.f32 %v434_v14, %v416_v52 }
  0xbd   :  { %v486_v17 = vpop.f32.mrf.mxu3 }
  0xbe   :  { %v487_v31 = vadd.f32 %v486_v17, %v79_v16 }
  0xc0   :  { %v453_v18 = vpop.f32.mrf.mxu2  ;;  %v503_v19 = vpop.f32.mrf.mxu0 }
  0xc1   :  { %v504_v22 = vadd.f32 %v503_v19, %v485_v21  ;;  %v522_v23 = vpop.f32.mrf.mxu1  ;;  %v454_v0 = vadd.f32 %v453_v18, %v435_v56 }
  0xc3   :  { %v523_v26 = vadd.f32 %v522_v23, %v504_v22  ;;  %v473_v5 = vadd.f32 %v1303_v62, %v454_v0 }
  0xc5   :  { %v489_v27 = vpop.f32.mrf.mxu3 }
  0xc6   :  { %v490_v46 = vadd.f32 %v489_v27, %v79_v16 }
  0xc8   :  { %v541_v28 = vpop.f32.mrf.mxu2  ;;  %v505_v29 = vpop.f32.mrf.mxu0 }
  0xc9   :  { %v542_v32 = vadd.f32 %v541_v28, %v523_v26  ;;  %v506_v35 = vadd.f32 %v505_v29, %v487_v31  ;;  %v524_v37 = vpop.f32.mrf.mxu1 }
  0xcb   :  { %v551_v34 = vpack.c.bf16 %v542_v32, %v466_v30  ;;  %v525_v38 = vadd.f32 %v524_v37, %v506_v35 }
  0xcd   :  { %558 = vst.msk [vmem:[%s1336_s3] sm:$0xff] %vm1308_vm4, %v551_v34  ;;  %v491_v39 = vpop.f32.mrf.mxu3 }
  0xce   :  { %v492_v60 = vadd.f32 %v491_v39, %v79_v16 }
  0xd0   :  { %v543_v41 = vpop.f32.mrf.mxu2 }
  0xd1   :  { %v544_v43 = vadd.f32 %v543_v41, %v525_v38  ;;  %v527_v47 = vpop.f32.mrf.mxu1 }
  0xd3   :  { %v552_v44 = vpack.c.bf16 %v544_v43, %v468_v42 }
  0xd5   :  { %559 = vst.msk [vmem:[%s1336_s3 + $0x8] sm:$0xff] %vm1308_vm4, %v552_v44  ;;  %v508_v48 = vpop.f32.mrf.mxu3 }
  0xd6   :  { %v509_v50 = vadd.f32 %v508_v48, %v490_v46 }
  0xd8   :  { %v546_v51 = vpop.f32.mrf.mxu2  ;;  %v528_v54 = vadd.f32 %v527_v47, %v509_v50 }
  0xd9   :  { %v529_v2 = vpop.f32.mrf.mxu1 }
  0xda   :  { %v547_v55 = vadd.f32 %v546_v51, %v528_v54 }
  0xdc   :  { %v553_v61 = vpack.c.bf16 %v547_v55, %v471_v53 }
  0xdd   :  { %v510_v63 = vpop.f32.mrf.mxu3 }
  0xde   :  { %560 = vst.msk [vmem:[%s1336_s3 + $0x10] sm:$0xff] %vm1308_vm4, %v553_v61  ;;  %v511_v1 = vadd.f32 %v510_v63, %v492_v60 }
  0xe0   :  { %v530_v3 = vadd.f32 %v529_v2, %v511_v1  ;;  %v548_v58 = vpop.f32.mrf.mxu2 }
  0xe2   :  { %v549_v6 = vadd.f32 %v548_v58, %v530_v3 }
  0xe4   :  { %v554_v4 = vpack.c.bf16 %v549_v6, %v473_v5 }
  0xe6   :  { %561 = vst.msk [vmem:[%s1336_s3 + $0x18] sm:$0xff] %vm1308_vm4, %v554_v4 }

</bundles_post_ra>
